<compile_context>
chip_gen: v5e
topology: v5e:2x2
jax: 0.10.0
libtpu: 0.0.40
codegen_flags: <defaults>
</compile_context>

<pallas_src>
import jax
import jax.numpy as jnp
from jax.experimental import pallas as pl
from jax.experimental.pallas import tpu as pltpu


def _round_up(x, m):
    return ((x + m - 1) // m) * m


def _elu(x):
    # ELU with alpha=1.0 (PyTorch default), f32, single EUP transcendental.
    # xn is clamped <= 0, so exp never overflows and the positive branch's
    # (discarded) value is finite.  exp(x)-1 cancellation near 0 is ~1e-7,
    # far below the bf16 noise of the surrounding casts.
    xn = jnp.minimum(x, 0.0)
    return jnp.where(x > 0, x, jnp.exp(xn) - 1.0)


def mlp_history_encoder_kernel(x_ref, w1_ref, b1_ref, w2_ref, b2_ref,
                               w3_ref, b3_ref, o_ref):
    # x_ref: (tile_b, d_in) in its native dtype (f32); cast to the weight
    # dtype only at the dot operand (no wrapper-side HBM pass).  Weights in
    # compute dtype, biases f32.  MXU accumulates in f32; bias add + ELU in
    # f32; intermediates are cast back to the weight dtype only at the dots.
    x = x_ref[...].astype(w1_ref.dtype)
    h = jnp.dot(x, w1_ref[...],
                preferred_element_type=jnp.float32) + b1_ref[...]
    h = _elu(h)
    h = jnp.dot(h.astype(w2_ref.dtype), w2_ref[...],
                preferred_element_type=jnp.float32) + b2_ref[...]
    h = _elu(h)
    out = jnp.dot(h.astype(w3_ref.dtype), w3_ref[...],
                  preferred_element_type=jnp.float32) + b3_ref[...]
    o_ref[...] = out.astype(o_ref.dtype)


def _auto_tile_b(bs):
    # Small batches are per-step-overhead / latency bound: one grid step
    # (block == full array, so no (8,128) divisibility concern).
    if bs <= 256:
        return bs
    # Large batches: big tiles so per-step overhead amortizes, but always
    # >= 2 grid steps so v7x can shard the "parallel" axis across its 2 TCs.
    cap = 2048
    half = _round_up(pl.cdiv(bs, 2), 8)   # multiple of 8 (sublane constraint)
    return min(cap, half)


def _vmem_limit_bytes(tile_b, d_in, h1, h2, d_out,
                      x_itemsize, w_itemsize, out_itemsize):
    est = (
        2 * tile_b * d_in * x_itemsize                        # x, 2 buffers
        + 2 * tile_b * d_out * out_itemsize                   # out, 2 buffers
        + 2 * (d_in * h1 + h1 * h2 + h2 * d_out) * w_itemsize  # weights
        + 2 * (h1 + h2 + d_out) * 4                           # biases (f32)
        + 4 * tile_b * max(h1, h2) * 4                        # f32 intermediates
    )
    # 1.5x headroom; never below the default scoped budget.
    return max(int(1.5 * est), 32 * 1024 * 1024)


def mlp_history_encoder(obs_history, params, *, tile_b=None,
                        compute_dtype=jnp.bfloat16, out_dtype=jnp.float32):
    """Forward pass of MLPHistoryEncoder.

    obs_history: (bs, T, obs_dim).
    params: (w1, b1, w2, b2, w3, b3) with w_i (in, out), b_i (1, out).
    Returns (bs, num_latent) in out_dtype (f32 by default; bf16 halves
    output writeback if the consumer tolerates it).
    """
    w1, b1, w2, b2, w3, b3 = params
    bs = obs_history.shape[0]
    x = obs_history.reshape(bs, -1)            # (bs, T*obs_dim) -- layout glue
    d_in, h1 = w1.shape
    h2 = w2.shape[1]
    d_out = w3.shape[1]

    # Weights (tiny, fetched once, resident across grid steps) go to the
    # matmul dtype; biases stay f32.  The activation cast happens inside the
    # kernel, so x is passed untouched.
    w1c = w1.astype(compute_dtype)
    w2c = w2.astype(compute_dtype)
    w3c = w3.astype(compute_dtype)
    b1c = b1.astype(jnp.float32)
    b2c = b2.astype(jnp.float32)
    b3c = b3.astype(jnp.float32)

    if tile_b is None:
        tile_b = _auto_tile_b(bs)
    grid = (pl.cdiv(bs, tile_b),)   # ragged last block: reads padded, writes masked

    full = lambda r, c: pl.BlockSpec((r, c), lambda i: (0, 0))

    flops = 2 * bs * (d_in * h1 + h1 * h2 + h2 * d_out)
    bytes_accessed = (
        x.size * x.dtype.itemsize
        + sum(a.size * a.dtype.itemsize
              for a in (w1c, b1c, w2c, b2c, w3c, b3c))
        + bs * d_out * jnp.dtype(out_dtype).itemsize)

    vmem_limit = _vmem_limit_bytes(
        tile_b, d_in, h1, h2, d_out,
        x.dtype.itemsize, jnp.dtype(compute_dtype).itemsize,
        jnp.dtype(out_dtype).itemsize)

    return pl.pallas_call(
        mlp_history_encoder_kernel,
        out_shape=jax.ShapeDtypeStruct((bs, d_out), out_dtype),
        grid=grid,
        in_specs=[
            pl.BlockSpec((tile_b, d_in), lambda i: (i, 0)),   # x, batch-tiled
            full(d_in, h1), full(1, h1),                      # W1, b1
            full(h1, h2), full(1, h2),                        # W2, b2
            full(h2, d_out), full(1, d_out),                  # W3, b3
        ],
        out_specs=pl.BlockSpec((tile_b, d_out), lambda i: (i, 0)),
        compiler_params=pltpu.CompilerParams(
            dimension_semantics=("parallel",),
            vmem_limit_bytes=vmem_limit),
        cost_estimate=pl.CostEstimate(
            flops=flops,
            transcendentals=bs * (h1 + h2),   # one exp per hidden element
            bytes_accessed=bytes_accessed),
    )(x, w1c, b1c, w2c, b2c, w3c, b3c)


def init_params(key, num_obs, num_history, num_latent,
                hidden=(256, 128), dtype=jnp.float32):
    d_in = num_obs * num_history
    dims = [d_in, hidden[0], hidden[1], num_latent]
    params = []
    for li in range(3):
        key, kw, kb = jax.random.split(key, 3)
        fan_in = dims[li]
        scale = 1.0 / jnp.sqrt(fan_in)
        w = jax.random.uniform(kw, (dims[li], dims[li + 1]),
                               minval=-scale, maxval=scale, dtype=dtype)
        b = jax.random.uniform(kb, (1, dims[li + 1]),
                               minval=-scale, maxval=scale, dtype=dtype)
        params += [w, b]
    return tuple(params)


def reference_forward(obs_history, params):
    w1, b1, w2, b2, w3, b3 = params
    x = obs_history.reshape(obs_history.shape[0], -1)
    h = jax.nn.elu(x @ w1 + b1)
    h = jax.nn.elu(h @ w2 + b2)
    return h @ w3 + b3


if __name__ == "__main__":
    # Shapes consistent with the module: bs=16, num_history=8, num_obs=16,
    # num_latent=32, hidden dims [256, 128].
    bs, num_history, num_obs, num_latent = 16, 8, 16, 32

    key = jax.random.PRNGKey(0)
    key, kx = jax.random.split(key)
    obs_history = jax.random.normal(kx, (bs, num_history, num_obs),
                                    dtype=jnp.float32)
    params = init_params(key, num_obs, num_history, num_latent)

    ref = reference_forward(obs_history, params)

    # Default path: in-kernel bf16 cast for matmuls, f32 accumulation.
    fwd = jax.jit(mlp_history_encoder)
    out = jax.block_until_ready(fwd(obs_history, params))
    assert out.shape == (bs, num_latent)
    assert jnp.allclose(out, ref, atol=3e-2, rtol=3e-2), \
        "bf16-path mismatch vs reference"

    # Full-f32 path: tight check of the kernel structure (tiling, ELU,
    # unpadded output).
    out_f32 = jax.block_until_ready(
        mlp_history_encoder(obs_history, params, compute_dtype=jnp.float32))
    assert out_f32.shape == (bs, num_latent)
    assert jnp.allclose(out_f32, ref, atol=1e-4, rtol=1e-4), \
        "f32-path mismatch vs reference"

    # Ragged multi-step grid path: bs not a multiple of the auto tile
    # (exercises the no-wrapper-pad masked last block).
    bs2 = 300
    key, kx2 = jax.random.split(key)
    obs2 = jax.random.normal(kx2, (bs2, num_history, num_obs),
                             dtype=jnp.float32)
    ref2 = reference_forward(obs2, params)
    out2 = jax.block_until_ready(
        mlp_history_encoder(obs2, params, compute_dtype=jnp.float32))
    assert out2.shape == (bs2, num_latent)
    assert jnp.allclose(out2, ref2, atol=1e-4, rtol=1e-4), \
        "ragged-grid f32 path mismatch vs reference"

    print("KERNEL_OK")
</pallas_src>

<mosaic_0001>
module attributes {stable_mosaic.version = 11 : i64} {
  func.func @mlp_history_encoder_kernel(%arg0: i32, %arg1: memref<16x128xf32, #tpu.memory_space<vmem>>, %arg2: memref<128x256xbf16, #tpu.memory_space<vmem>>, %arg3: memref<1x256xf32, #tpu.memory_space<vmem>>, %arg4: memref<256x128xbf16, #tpu.memory_space<vmem>>, %arg5: memref<1x128xf32, #tpu.memory_space<vmem>>, %arg6: memref<128x32xbf16, #tpu.memory_space<vmem>>, %arg7: memref<1x32xf32, #tpu.memory_space<vmem>>, %arg8: memref<16x32xf32, #tpu.memory_space<vmem>>) attributes {dimension_semantics = [#tpu.dimension_semantics<parallel>], iteration_bounds = array<i64: 1>, scalar_prefetch = 0 : i64, scratch_operands = 0 : i64, tpu.core_type = #tpu.core_type<tc>, window_params = [{transform_indices = @transform_0, window_bounds = array<i64: 16, 128>}, {pipeline_mode = #tpu.pipeline_mode<synchronous>, transform_indices = @transform_1, window_bounds = array<i64: 128, 256>}, {pipeline_mode = #tpu.pipeline_mode<synchronous>, transform_indices = @transform_2, window_bounds = array<i64: 1, 256>}, {pipeline_mode = #tpu.pipeline_mode<synchronous>, transform_indices = @transform_3, window_bounds = array<i64: 256, 128>}, {pipeline_mode = #tpu.pipeline_mode<synchronous>, transform_indices = @transform_4, window_bounds = array<i64: 1, 128>}, {pipeline_mode = #tpu.pipeline_mode<synchronous>, transform_indices = @transform_5, window_bounds = array<i64: 128, 32>}, {pipeline_mode = #tpu.pipeline_mode<synchronous>, transform_indices = @transform_6, window_bounds = array<i64: 1, 32>}, {transform_indices = @transform_7, window_bounds = array<i64: 16, 32>}]} {
    %c0 = arith.constant 0 : index
    %c0_0 = arith.constant 0 : index
    %0 = vector.load %arg1[%c0, %c0_0] : memref<16x128xf32, #tpu.memory_space<vmem>>, vector<16x128xf32>
    %1 = arith.truncf %0 : vector<16x128xf32> to vector<16x128xbf16>
    %c0_1 = arith.constant 0 : index
    %c0_2 = arith.constant 0 : index
    %2 = vector.load %arg2[%c0_1, %c0_2] : memref<128x256xbf16, #tpu.memory_space<vmem>>, vector<128x256xbf16>
    %cst = arith.constant dense<0.000000e+00> : vector<16x256xf32>
    %3 = tpu.matmul %1, %2, %cst {dimension_numbers = #tpu.dot_dimension_numbers<[1], [0], [0], [1], [0, 0, 1, 1], [], []>} : vector<16x128xbf16>, vector<128x256xbf16>, vector<16x256xf32> -> vector<16x256xf32>
    %c0_3 = arith.constant 0 : index
    %c0_4 = arith.constant 0 : index
    %4 = vector.load %arg3[%c0_3, %c0_4] : memref<1x256xf32, #tpu.memory_space<vmem>>, vector<1x256xf32>
    %5 = vector.broadcast %4 : vector<1x256xf32> to vector<16x256xf32>
    %6 = arith.addf %3, %5 : vector<16x256xf32>
    %cst_5 = arith.constant 0.000000e+00 : f32
    %7 = vector.broadcast %cst_5 : f32 to vector<16x256xf32>
    %8 = arith.minimumf %6, %7 : vector<16x256xf32>
    %cst_6 = arith.constant 0.000000e+00 : f32
    %9 = vector.broadcast %cst_6 : f32 to vector<16x256xf32>
    %10 = arith.cmpf ogt, %6, %9 : vector<16x256xf32>
    %11 = math.exp %8 : vector<16x256xf32>
    %cst_7 = arith.constant 1.000000e+00 : f32
    %12 = vector.broadcast %cst_7 : f32 to vector<16x256xf32>
    %13 = arith.subf %11, %12 : vector<16x256xf32>
    %14 = arith.select %10, %6, %13 : vector<16x256xi1>, vector<16x256xf32>
    %15 = arith.truncf %14 : vector<16x256xf32> to vector<16x256xbf16>
    %c0_8 = arith.constant 0 : index
    %c0_9 = arith.constant 0 : index
    %16 = vector.load %arg4[%c0_8, %c0_9] : memref<256x128xbf16, #tpu.memory_space<vmem>>, vector<256x128xbf16>
    %cst_10 = arith.constant dense<0.000000e+00> : vector<16x128xf32>
    %17 = tpu.matmul %15, %16, %cst_10 {dimension_numbers = #tpu.dot_dimension_numbers<[1], [0], [0], [1], [0, 0, 1, 1], [], []>} : vector<16x256xbf16>, vector<256x128xbf16>, vector<16x128xf32> -> vector<16x128xf32>
    %c0_11 = arith.constant 0 : index
    %c0_12 = arith.constant 0 : index
    %18 = vector.load %arg5[%c0_11, %c0_12] : memref<1x128xf32, #tpu.memory_space<vmem>>, vector<1x128xf32>
    %19 = vector.broadcast %18 : vector<1x128xf32> to vector<16x128xf32>
    %20 = arith.addf %17, %19 : vector<16x128xf32>
    %cst_13 = arith.constant 0.000000e+00 : f32
    %21 = vector.broadcast %cst_13 : f32 to vector<16x128xf32>
    %22 = arith.minimumf %20, %21 : vector<16x128xf32>
    %cst_14 = arith.constant 0.000000e+00 : f32
    %23 = vector.broadcast %cst_14 : f32 to vector<16x128xf32>
    %24 = arith.cmpf ogt, %20, %23 : vector<16x128xf32>
    %25 = math.exp %22 : vector<16x128xf32>
    %cst_15 = arith.constant 1.000000e+00 : f32
    %26 = vector.broadcast %cst_15 : f32 to vector<16x128xf32>
    %27 = arith.subf %25, %26 : vector<16x128xf32>
    %28 = arith.select %24, %20, %27 : vector<16x128xi1>, vector<16x128xf32>
    %29 = arith.truncf %28 : vector<16x128xf32> to vector<16x128xbf16>
    %c0_16 = arith.constant 0 : index
    %c0_17 = arith.constant 0 : index
    %30 = vector.load %arg6[%c0_16, %c0_17] : memref<128x32xbf16, #tpu.memory_space<vmem>>, vector<128x32xbf16>
    %cst_18 = arith.constant dense<0.000000e+00> : vector<16x32xf32>
    %31 = tpu.matmul %29, %30, %cst_18 {dimension_numbers = #tpu.dot_dimension_numbers<[1], [0], [0], [1], [0, 0, 1, 1], [], []>} : vector<16x128xbf16>, vector<128x32xbf16>, vector<16x32xf32> -> vector<16x32xf32>
    %c0_19 = arith.constant 0 : index
    %c0_20 = arith.constant 0 : index
    %32 = vector.load %arg7[%c0_19, %c0_20] : memref<1x32xf32, #tpu.memory_space<vmem>>, vector<1x32xf32>
    %33 = vector.broadcast %32 : vector<1x32xf32> to vector<16x32xf32>
    %34 = arith.addf %31, %33 : vector<16x32xf32>
    %c0_21 = arith.constant 0 : index
    %c0_22 = arith.constant 0 : index
    %35 = vector.load %arg8[%c0_21, %c0_22] : memref<16x32xf32, #tpu.memory_space<vmem>>, vector<16x32xf32>
    tpu.vector_store %arg8[%c0_21, %c0_22], %34 {strides = array<i32>} : memref<16x32xf32, #tpu.memory_space<vmem>>, vector<16x32xf32>,
    return
  }
  func.func @transform_0(%arg0: i32) -> (i32, i32) {
    %c0_i32 = arith.constant 0 : i32
    %c0_i32_0 = arith.constant 0 : i32
    return %arg0, %c0_i32 : i32, i32
  }
  func.func @transform_1(%arg0: i32) -> (i32, i32) {
    %c0_i32 = arith.constant 0 : i32
    %c0_i32_0 = arith.constant 0 : i32
    %c0_i32_1 = arith.constant 0 : i32
    return %c0_i32, %c0_i32_0 : i32, i32
  }
  func.func @transform_2(%arg0: i32) -> (i32, i32) {
    %c0_i32 = arith.constant 0 : i32
    %c0_i32_0 = arith.constant 0 : i32
    %c0_i32_1 = arith.constant 0 : i32
    return %c0_i32, %c0_i32_0 : i32, i32
  }
  func.func @transform_3(%arg0: i32) -> (i32, i32) {
    %c0_i32 = arith.constant 0 : i32
    %c0_i32_0 = arith.constant 0 : i32
    %c0_i32_1 = arith.constant 0 : i32
    return %c0_i32, %c0_i32_0 : i32, i32
  }
  func.func @transform_4(%arg0: i32) -> (i32, i32) {
    %c0_i32 = arith.constant 0 : i32
    %c0_i32_0 = arith.constant 0 : i32
    %c0_i32_1 = arith.constant 0 : i32
    return %c0_i32, %c0_i32_0 : i32, i32
  }
  func.func @transform_5(%arg0: i32) -> (i32, i32) {
    %c0_i32 = arith.constant 0 : i32
    %c0_i32_0 = arith.constant 0 : i32
    %c0_i32_1 = arith.constant 0 : i32
    return %c0_i32, %c0_i32_0 : i32, i32
  }
  func.func @transform_6(%arg0: i32) -> (i32, i32) {
    %c0_i32 = arith.constant 0 : i32
    %c0_i32_0 = arith.constant 0 : i32
    %c0_i32_1 = arith.constant 0 : i32
    return %c0_i32, %c0_i32_0 : i32, i32
  }
  func.func @transform_7(%arg0: i32) -> (i32, i32) {
    %c0_i32 = arith.constant 0 : i32
    %c0_i32_0 = arith.constant 0 : i32
    return %arg0, %c0_i32 : i32, i32
  }
}

</mosaic_0001>

<bundles_post_ra>
// kernel: mlp_history_encoder.1
= control target key start
LH: loop header
LB: loop body
LE: loop exit
PB: predicated region body
PF: predicated region fallthrough
CT: control target
= control target key end

     0   :  { %s940_s0 = inlined_call_operand.vmem [shape: f32[16,128], index: 0, kind: input, shape index: {}]   ;;  %s941_s1 = inlined_call_operand.vmem [shape: bf16[128,256], index: 1, kind: input, shape index: {}]   ;;  %s942_s2 = inlined_call_operand.vmem [shape: f32[1,256], index: 2, kind: input, shape index: {}]   ;;  %s943_s3 = inlined_call_operand.vmem [shape: bf16[256,128], index: 3, kind: input, shape index: {}]   ;;  %s944_s4 = inlined_call_operand.vmem [shape: f32[1,128], index: 4, kind: input, shape index: {}]   ;;  %s945_s5 = inlined_call_operand.vmem [shape: bf16[128,32], index: 5, kind: input, shape index: {}]   ;;  %s946_s6 = inlined_call_operand.vmem [shape: f32[1,32], index: 6, kind: input, shape index: {}]   ;;  %s947_s7 = inlined_call_operand.hbm [shape: f32[16,32], index: 7, kind: output, shape index: {}]  }
   0x1   :  { %v520_v0 = vld [vmem:[%s941_s1 + $0x70] sm:$0xf]  ;;  %v643_v1 = vld [vmem:[%s941_s1 + $0x74] sm:$0xf0]  ;;  %v642_v2 = vld [vmem:[%s941_s1 + $0x74] sm:$0xf] }
   0x2   :  { %v521_v3 = vor.u32 %v643_v1, %v520_v0  ;;  %v522_v4 = vld [vmem:[%s941_s1 + $0x78] sm:$0xf0]  ;;  %v512_v5 = vld [vmem:[%s941_s1 + $0x60] sm:$0xf]  ;;  %v641_v6 = vld [vmem:[%s941_s1 + $0x64] sm:$0xf0] }
   0x3   :  { %v525_v7 = vor.u32 %v642_v2, %v522_v4  ;;  %v640_v8 = vld [vmem:[%s941_s1 + $0x64] sm:$0xf]  ;;  %v514_v9 = vld [vmem:[%s941_s1 + $0x68] sm:$0xf0]  ;;  %v513_v10 = vor.u32 %v641_v6, %v512_v5  ;;  %v504_v12 = vld [vmem:[%s941_s1 + $0x50] sm:$0xf] }
   0x4   :  { %132 = vmatpush.bf16.msra.mxu0 %v521_v3  ;;  %v517_v11 = vor.u32 %v640_v8, %v514_v9  ;;  %v639_v13 = vld [vmem:[%s941_s1 + $0x54] sm:$0xf0]  ;;  %v638_v14 = vld [vmem:[%s941_s1 + $0x54] sm:$0xf]  ;;  %v506_v15 = vld [vmem:[%s941_s1 + $0x58] sm:$0xf0] }
   0x5   :  { %146 = vmatpush.bf16.msra.mxu1 %v525_v7  ;;  %v505_v16 = vor.u32 %v639_v13, %v504_v12  ;;  %v509_v17 = vor.u32 %v638_v14, %v506_v15  ;;  %v496_v18 = vld [vmem:[%s941_s1 + $0x40] sm:$0xf]  ;;  %v637_v19 = vld [vmem:[%s941_s1 + $0x44] sm:$0xf0]  ;;  %v636_v20 = vld [vmem:[%s941_s1 + $0x44] sm:$0xf] }
   0x6   :  { %v498_v21 = vld [vmem:[%s941_s1 + $0x48] sm:$0xf0]  ;;  %v497_v22 = vor.u32 %v637_v19, %v496_v18  ;;  %v488_v23 = vld [vmem:[%s941_s1 + $0x30] sm:$0xf]  ;;  %v651_v24 = vld [vmem:[%s943_s3 + $0x38] sm:$0xff] }
   0x7   :  { %v659_v25 = vld [vmem:[%s943_s3 + $0x78] sm:$0xff]  ;;  %v501_v26 = vor.u32 %v636_v20, %v498_v21  ;;  %v634_v28 = vld [vmem:[%s941_s1 + $0x34] sm:$0xf]  ;;  %318 = vmatpush.bf16.msra.mxu2 %v651_v24 }
   0x8   :  { %133 = vmatpush.bf16.msra.mxu0 %v513_v10  ;;  %v635_v27 = vld [vmem:[%s941_s1 + $0x34] sm:$0xf0]  ;;  %v490_v29 = vld [vmem:[%s941_s1 + $0x38] sm:$0xf0]  ;;  %332 = vmatpush.bf16.msra.mxu3 %v659_v25 }
   0x9   :  { %147 = vmatpush.bf16.msra.mxu1 %v517_v11 }
   0xc   :  { %134 = vmatpush.bf16.msra.mxu0 %v505_v16 }
   0xd   :  { %148 = vmatpush.bf16.msra.mxu1 %v509_v17 }
   0xe   :  { %12 = vsyncpa [#allocation3], 0  ;;  %v489_v30 = vor.u32 %v635_v27, %v488_v23  ;;  %v493_v31 = vor.u32 %v634_v28, %v490_v29  ;;  %v480_v32 = vld [vmem:[%s941_s1 + $0x20] sm:$0xf]  ;;  %v633_v33 = vld [vmem:[%s941_s1 + $0x24] sm:$0xf0] }
   0xf   :  { %v632_v34 = vld [vmem:[%s941_s1 + $0x24] sm:$0xf]  ;;  %v482_v35 = vld [vmem:[%s941_s1 + $0x28] sm:$0xf0]  ;;  %v481_v36 = vor.u32 %v633_v33, %v480_v32  ;;  %v472_v38 = vld [vmem:[%s941_s1 + $0x10] sm:$0xf] }
  0x10   :  { %135 = vmatpush.bf16.msra.mxu0 %v497_v22  ;;  %v485_v37 = vor.u32 %v632_v34, %v482_v35  ;;  %v631_v39 = vld [vmem:[%s941_s1 + $0x14] sm:$0xf0]  ;;  %v630_v40 = vld [vmem:[%s941_s1 + $0x14] sm:$0xf]  ;;  %v474_v41 = vld [vmem:[%s941_s1 + $0x18] sm:$0xf0] }
  0x11   :  { %149 = vmatpush.bf16.msra.mxu1 %v501_v26  ;;  %v473_v42 = vor.u32 %v631_v39, %v472_v38  ;;  %v477_v43 = vor.u32 %v630_v40, %v474_v41  ;;  %v464_v44 = vld [vmem:[%s941_s1] sm:$0xf]  ;;  %v629_v45 = vld [vmem:[%s941_s1 + $0x4] sm:$0xf0]  ;;  %v628_v46 = vld [vmem:[%s941_s1 + $0x4] sm:$0xf] }
  0x12   :  { %v466_v47 = vld [vmem:[%s941_s1 + $0x8] sm:$0xf0]  ;;  %v465_v48 = vor.u32 %v629_v45, %v464_v44  ;;  %v27_v49 = vld [vmem:[%s940_s0] sm:$0xff]  ;;  %v650_v53 = vld [vmem:[%s943_s3 + $0x30] sm:$0xff]  ;;  %vm441_vm6 = vcmask 261120   ;;  %s711_s23 = smov [#allocation2]  }
  0x13   :  { %v28_v50 = vld [vmem:[%s940_s0 + $0x8] sm:$0xff]  ;;  %v469_v51 = vor.u32 %v628_v46, %v466_v47  ;;  %v658_v54 = vld [vmem:[%s943_s3 + $0x70] sm:$0xff]  ;;  %319 = vmatpush.bf16.msra.mxu2 %v650_v53  ;;  %v648_v57 = vld [vmem:[%s943_s3 + $0x20] sm:$0xff]  ;;  %s448_s24 = sshll.u32 %s711_s23, 4  ;;  %s450_s27 = sshll.u32 %s947_s7, 4  ;;  %s449_s24 = int_to_ptr.vmem [resolvable:$true] %s448_s24  ;;  %s451_s27 = int_to_ptr.hbm [resolvable:$true] %s450_s27 }
  0x14   :  { %136 = vmatpush.bf16.msra.mxu0 %v489_v30  ;;  %v29_v52 = vpack.c.bf16 %v28_v50, %v27_v49  ;;  %333 = vmatpush.bf16.msra.mxu3 %v658_v54  ;;  %v649_v55 = vld [vmem:[%s943_s3 + $0x28] sm:$0xff]  ;;  %v656_v58 = vld [vmem:[%s943_s3 + $0x60] sm:$0xff]  ;;  %v647_v59 = vld [vmem:[%s943_s3 + $0x18] sm:$0xff]  ;;  %s712_s28 = smov 128   ;;  %s713_s1 = smov 8  }
  0x15   :  { %150 = vmatpush.bf16.msra.mxu1 %v493_v31  ;;  %v657_v56 = vld [vmem:[%s943_s3 + $0x68] sm:$0xff]  ;;  %v655_v60 = vld [vmem:[%s943_s3 + $0x58] sm:$0xff]  ;;  %v646_v61 = vld [vmem:[%s943_s3 + $0x10] sm:$0xff] }
  0x16   :  { %v654_v62 = vld [vmem:[%s943_s3 + $0x50] sm:$0xff]  ;;  %v645_v63 = vld [vmem:[%s943_s3 + $0x8] sm:$0xff]  ;;  %v644_v1 = vld [vmem:[%s943_s3] sm:$0xff] }
  0x17   :  { %320 = vmatpush.bf16.msra.mxu2 %v649_v55  ;;  %v653_v0 = vld [vmem:[%s943_s3 + $0x48] sm:$0xff]  ;;  %v652_v2 = vld [vmem:[%s943_s3 + $0x40] sm:$0xff]  ;;  %v667_v4 = vld [vmem:[%s945_s5 + $0x38] sm:$0xff] }
  0x18   :  { %137 = vmatpush.bf16.msra.mxu0 %v481_v36  ;;  %334 = vmatpush.bf16.msra.mxu3 %v657_v56  ;;  %v46_v3 = vld [vmem:[%s942_s2] sm:$0x3]  ;;  %v665_v38 = vld [vmem:[%s945_s5 + $0x28] sm:$0xff]  ;;  %v663_v40 = vld [vmem:[%s945_s5 + $0x18] sm:$0xff] }
  0x19   :  { %151 = vmatpush.bf16.msra.mxu1 %v485_v37  ;;  %v48_v5 = vperm.slane %v46_v3, 0  ;;  %v49_v6 = vperm.slane %v46_v3, 1  ;;  %v666_v37 = vld [vmem:[%s945_s5 + $0x30] sm:$0xff]  ;;  %v664_v39 = vld [vmem:[%s945_s5 + $0x20] sm:$0xff] }
  0x1a   :  { %v662_v41 = vld [vmem:[%s945_s5 + $0x10] sm:$0xff]  ;;  %v671_v44 = vld [vmem:[%s944_s4] ss:$0 sm:$0xff] }
  0x1b   :  { %321 = vmatpush.bf16.msra.mxu2 %v648_v57 }
  0x1c   :  { %138 = vmatpush.bf16.msra.mxu0 %v473_v42  ;;  %335 = vmatpush.bf16.msra.mxu3 %v656_v58  ;;  %v661_v42 = vld [vmem:[%s945_s5 + $0x8] sm:$0xff] }
  0x1d   :  { %152 = vmatpush.bf16.msra.mxu1 %v477_v43  ;;  %v660_v43 = vld [vmem:[%s945_s5] sm:$0xff] }
  0x1f   :  { %322 = vmatpush.bf16.msra.mxu2 %v647_v59 }
  0x20   :  { %139 = vmatpush.bf16.msra.mxu0 %v465_v48  ;;  %336 = vmatpush.bf16.msra.mxu3 %v655_v60 }
  0x21   :  { %153 = vmatpush.bf16.msra.mxu1 %v469_v51 }
  0x23   :  { %140 = vmatmul.bf16.vlgmr.msra.gmra.mxu0 %v29_v52  ;;  %323 = vmatpush.bf16.msra.mxu2 %v646_v61 }
  0x24   :  { %154 = vmatmul.bf16.vlgmr.msra.gmra.mxu1 %v29_v52  ;;  %337 = vmatpush.bf16.msra.mxu3 %v654_v62 }
  0x25   :  { %427 = vmatpush.bf16.msrb.mxu0 %v667_v4 }
  0x27   :  { %324 = vmatpush.bf16.msra.mxu2 %v645_v63 }
  0x28   :  { %338 = vmatpush.bf16.msra.mxu3 %v653_v0  ;;  %v672_v0 = vld [vmem:[%s946_s6] ss:$0 sm:$0xff] }
  0x29   :  { %428 = vmatpush.bf16.msrb.mxu0 %v666_v37 }
  0x2b   :  { %325 = vmatpush.bf16.msra.mxu2 %v644_v1 }
  0x2c   :  { %339 = vmatpush.bf16.msra.mxu3 %v652_v2 }
  0x2d   :  { %429 = vmatpush.bf16.msrb.mxu0 %v665_v38 }
  0x31   :  { %430 = vmatpush.bf16.msrb.mxu0 %v664_v39 }
  0x35   :  { %431 = vmatpush.bf16.msrb.mxu0 %v663_v40 }
  0x39   :  { %432 = vmatpush.bf16.msrb.mxu0 %v662_v41 }
  0x3d   :  { %433 = vmatpush.bf16.msrb.mxu0 %v661_v42 }
  0x41   :  { %434 = vmatpush.bf16.msrb.mxu0 %v660_v43 }
  0xa0   :  { %v141_v7 = vpop.f32.mrf.mxu0 }
  0xa1   :  { %v142_v8 = vadd.f32 %v141_v7, %v48_v5  ;;  %v155_v9 = vpop.f32.mrf.mxu1 }
  0xa2   :  { %v156_v10 = vadd.f32 %v155_v9, %v49_v6 }
  0xa3   :  { %v160_v11 = vmin.f32 %v142_v8, 0.0  ;;  %vm164_vm0 = vcmp.gt.f32.partialorder %v142_v8, 0.0 }
  0xa4   :  { %v161_v12 = vmin.f32 %v156_v10, 0.0  ;;  %vm165_vm2 = vcmp.gt.f32.partialorder %v156_v10, 0.0 }
  0xa5   :  { %v168_v13 = vmul.f32 1.442695, %v160_v11 }
  0xa6   :  { %v170_v14 = vmul.f32 1.442695, %v161_v12 }
  0xa7   :  { %673 = vpow2.f32 %v168_v13 }
  0xa8   :  { %v143_v15 = vpop.f32.mrf.mxu0  ;;  %675 = vpow2.f32 %v170_v14 }
  0xa9   :  { %v144_v16 = vadd.f32 %v143_v15, %v48_v5  ;;  %v157_v17 = vpop.f32.mrf.mxu1 }
  0xaa   :  { %v158_v18 = vadd.f32 %v157_v17, %v49_v6 }
  0xab   :  { %v162_v19 = vmin.f32 %v144_v16, 0.0  ;;  %vm166_vm1 = vcmp.gt.f32.partialorder %v144_v16, 0.0 }
  0xac   :  { %v163_v20 = vmin.f32 %v158_v18, 0.0  ;;  %vm167_vm3 = vcmp.gt.f32.partialorder %v158_v18, 0.0 }
  0xad   :  { %v172_v21 = vmul.f32 1.442695, %v162_v19  ;;  %v674_v23 = vpop.eup %673 }
  0xae   :  { %v174_v22 = vmul.f32 1.442695, %v163_v20  ;;  %v676_v24 = vpop.eup %675  ;;  %v526_v25 = vadd.f32 -1.0, %v674_v23 }
  0xaf   :  { %677 = vpow2.f32 %v172_v21  ;;  %v527_v27 = vadd.f32 -1.0, %v676_v24 }
  0xb0   :  { %679 = vpow2.f32 %v174_v22  ;;  %v180_v31 = vsel %vm164_vm0, %v142_v8, %v526_v25 }
  0xb1   :  { %v181_v34 = vsel %vm165_vm2, %v156_v10, %v527_v27 }
  0xb5   :  { %v678_v26 = vpop.eup %677 }
  0xb6   :  { %v680_v28 = vpop.eup %679  ;;  %v528_v29 = vadd.f32 -1.0, %v678_v26 }
  0xb7   :  { %v529_v30 = vadd.f32 -1.0, %v680_v28 }
  0xb8   :  { %v182_v32 = vsel %vm166_vm1, %v144_v16, %v528_v29 }
  0xb9   :  { %v184_v33 = vpack.c.bf16 %v182_v32, %v180_v31  ;;  %v183_v35 = vsel %vm167_vm3, %v158_v18, %v529_v30 }
  0xba   :  { %v185_v36 = vpack.c.bf16 %v183_v35, %v181_v34 }
  0xbb   :  { %326 = vmatmul.bf16.vlgmr.msra.gmra.mxu2 %v184_v33 }
  0xbc   :  { %340 = vmatmul.bf16.vlgmr.msra.gmra.mxu3 %v185_v36 }
 0x13e   :  { %v327_v45 = vpop.f32.mrf.mxu2 }
 0x13f   :  { %v328_v46 = vadd.f32 %v671_v44, %v327_v45  ;;  %v341_v47 = vpop.f32.mrf.mxu3 }
 0x141   :  { %v342_v48 = vadd.f32 %v341_v47, %v328_v46 }
 0x143   :  { %v346_v49 = vmin.f32 %v342_v48, 0.0  ;;  %vm348_vm4 = vcmp.gt.f32.partialorder %v342_v48, 0.0 }
 0x145   :  { %v350_v51 = vmul.f32 1.442695, %v346_v49 }
 0x146   :  { %v329_v50 = vpop.f32.mrf.mxu2 }
 0x147   :  { %v330_v52 = vadd.f32 %v671_v44, %v329_v50  ;;  %v343_v53 = vpop.f32.mrf.mxu3  ;;  %681 = vpow2.f32 %v350_v51 }
 0x149   :  { %v344_v54 = vadd.f32 %v343_v53, %v330_v52 }
 0x14b   :  { %v347_v55 = vmin.f32 %v344_v54, 0.0  ;;  %vm349_vm5 = vcmp.gt.f32.partialorder %v344_v54, 0.0 }
 0x14d   :  { %v352_v56 = vmul.f32 1.442695, %v347_v55  ;;  %v682_v57 = vpop.eup %681 }
 0x14e   :  { %v594_v58 = vadd.f32 -1.0, %v682_v57 }
 0x14f   :  { %683 = vpow2.f32 %v352_v56 }
 0x150   :  { %v356_v61 = vsel %vm348_vm4, %v342_v48, %v594_v58 }
 0x155   :  { %v684_v59 = vpop.eup %683 }
 0x156   :  { %v595_v60 = vadd.f32 -1.0, %v684_v59 }
 0x158   :  { %v357_v62 = vsel %vm349_vm5, %v344_v54, %v595_v60 }
 0x159   :  { %v358_v63 = vpack.c.bf16 %v357_v62, %v356_v61 }
 0x15b   :  { %435 = vmatmul.bf16.vlgmr.msrb.gmra.mxu0 %v358_v63 }
 0x1d8   :  { %v436_v1 = vpop.f32.mrf.mxu0 }
 0x1d9   :  { %v437_v2 = vadd.f32 %v672_v0, %v436_v1 }
 0x1db   :  { %442 = vst.msk [vmem:[#allocation2] sm:$0xff] %vm441_vm6, %v437_v2 }
 0x1e0   :  { %v438_v3 = vpop.f32.mrf.mxu0 }
 0x1e1   :  { %v439_v4 = vadd.f32 %v672_v0, %v438_v3 }
 0x1e3   :  { %443 = vst.msk [vmem:[#allocation2 + $0x8] sm:$0xff] %vm441_vm6, %v439_v4 }
 0x1e4   :  { %456 = dma.vmem_to_hbm [thread:$0]  %s449_s24, 256, %s451_s27, [#allocation3], %s712_s28, %s712_s28, %s713_s1  }
 0x1e5   :  { %709 = dma.done.wait [#allocation3], 256  }
 0x1e6   :  { %710 = vsyncadd [#allocation3], 4294967040 }
 0x1e7   :  { %461 = vsyncpa [#allocation3], 1 }

</bundles_post_ra>
